<compile_context>
chip_gen: v7x
topology: tpu7x:2x2x1
jax: 0.10.0
libtpu: 0.0.40
codegen_flags: <defaults>
</compile_context>

<pallas_src>
import jax
import jax.numpy as jnp
from jax.experimental import pallas as pl
from jax.experimental.pallas import tpu as pltpu

_LANE = 128
_FEATURE_ALIGN = 256          # full MXU tile on v6e/v7x (128 already full on v5e)
_SUBLANE = 16                 # bf16 sublane pack
_VMEM_BUDGET = 40 * 1024 * 1024   # conservative vs v7x 64 MiB / TC


def _round_up(v, m):
    return (v + m - 1) // m * m


def _mlp_kernel(x_ref, w1t_ref, b1_ref, w2t_ref, b2_ref, o_ref, acc_ref):
    # x_ref:   [TB, In_p]   w1t_ref: [In_p, TH]   b1_ref: [1, TH]
    # w2t_ref: [TH, Out_p]  b2_ref:  [1, Out_p]   o_ref:  [TB, Out_p]
    # acc_ref: [TB, Out_p] f32 scratch, accumulates fc2 over H tiles.
    hi = pl.program_id(1)

    @pl.when(hi == 0)
    def _():
        acc_ref[...] = jnp.zeros_like(acc_ref)

    # fc1 (this H-slice) + ReLU: bf16 MXU matmul, f32 accumulation/epilogue.
    h = jnp.dot(x_ref[...], w1t_ref[...], preferred_element_type=jnp.float32)
    h = jnp.maximum(h + b1_ref[...], 0.0)

    # fc2 partial contribution of this H-slice, accumulated in f32.
    acc_ref[...] += jnp.dot(h.astype(w2t_ref.dtype), w2t_ref[...],
                            preferred_element_type=jnp.float32)

    @pl.when(hi == pl.num_programs(1) - 1)
    def _():
        o_ref[...] = (acc_ref[...] + b2_ref[...]).astype(o_ref.dtype)


def _vmem_estimate(TB, In_p, TH, Out_p, num_h, w_itemsize):
    nbuf_w = 1 if num_h == 1 else 2          # Buffered(1) when resident, else 2
    weights = nbuf_w * (In_p * TH + TH * Out_p) * w_itemsize
    biases = nbuf_w * 8 * TH * 4 + 8 * Out_p * 4
    x_tiles = 2 * TB * In_p * w_itemsize
    out_tiles = 2 * TB * Out_p * 4
    acc = TB * Out_p * 4
    h_tmp = TB * TH * 4
    return weights + biases + x_tiles + out_tiles + acc + h_tmp


def prepare_mlp_params(w1, b1, w2, b2, compute_dtype=jnp.bfloat16):
    """Pad/transpose/cast weights ONCE (hoisted out of the per-call path)."""
    H, In = w1.shape
    Out = w2.shape[0]
    In_p = _round_up(In, _FEATURE_ALIGN)
    H_p = _round_up(H, _FEATURE_ALIGN)
    Out_p = _round_up(Out, _LANE) if Out <= _LANE else _round_up(Out, _FEATURE_ALIGN)

    w1t = jnp.zeros((In_p, H_p), compute_dtype).at[:In, :H].set(
        w1.T.astype(compute_dtype))
    w2t = jnp.zeros((H_p, Out_p), compute_dtype).at[:H, :Out].set(
        w2.T.astype(compute_dtype))
    b1_p = jnp.zeros((1, H_p), jnp.float32).at[0, :H].set(b1.astype(jnp.float32))
    b2_p = jnp.zeros((1, Out_p), jnp.float32).at[0, :Out].set(b2.astype(jnp.float32))
    return {"w1t": w1t, "b1": b1_p, "w2t": w2t, "b2": b2_p,
            "in_size": In, "hidden_size": H, "out_size": Out}


def two_layer_mlp_forward(x, params, *, vmem_budget=_VMEM_BUDGET):
    w1t, b1_p, w2t, b2_p = params["w1t"], params["b1"], params["w2t"], params["b2"]
    In, Out = params["in_size"], params["out_size"]
    In_p, H_p = w1t.shape
    Out_p = w2t.shape[1]
    compute_dtype = w1t.dtype
    itemsize = jnp.dtype(compute_dtype).itemsize

    lead_shape = x.shape[:-1]
    x2 = x.reshape(-1, x.shape[-1])
    B = x2.shape[0]
    assert x2.shape[1] == In

    # ---- batch tiling: >=2 tiles once B >= 64 (keeps both v7x TCs busy);
    #      TB chosen so padding waste is < one tile.
    num_b = max(1, pl.cdiv(B, 512))
    if num_b == 1 and B >= 64:
        num_b = 2
    TB = _round_up(pl.cdiv(B, num_b), _SUBLANE)
    B_p = TB * num_b

    # ---- H tiling: largest TH (divisor of H_p, multiple of 256) under budget.
    h_units = H_p // _FEATURE_ALIGN
    num_h = 1
    while (_vmem_estimate(TB, In_p, H_p // num_h, Out_p, num_h, itemsize) > vmem_budget
           and H_p // num_h > _FEATURE_ALIGN):
        num_h += 1
        while h_units % num_h:
            num_h += 1
    TH = H_p // num_h

    # ---- input: skip the pad/copy entirely when shapes/dtype already line up.
    if B_p == B and In_p == In and x2.dtype == compute_dtype:
        x_p = x2
    else:
        x_p = (jnp.zeros((B_p, In_p), compute_dtype)
               .at[:B, :In].set(x2.astype(compute_dtype)))

    def spec(shape, index_map, mode=None):
        if mode is None:
            return pl.BlockSpec(shape, index_map)
        return pl.BlockSpec(shape, index_map, pipeline_mode=mode)

    resident = pl.Buffered(1)                    # constant-index blocks: 1 buffer
    w_mode = resident if num_h == 1 else None    # H-sliced weights need prefetch

    vmem_limit = int(min(64 << 20, max(32 << 20, int(
        _vmem_estimate(TB, In_p, TH, Out_p, num_h, itemsize) * 1.4))))

    out_p = pl.pallas_call(
        _mlp_kernel,
        out_shape=jax.ShapeDtypeStruct((B_p, Out_p), jnp.float32),
        grid=(num_b, num_h),
        in_specs=[
            spec((TB, In_p), lambda i, h: (i, 0)),            # streamed activations
            spec((In_p, TH), lambda i, h: (0, h), w_mode),    # fc1 weights
            spec((1, TH), lambda i, h: (0, h), w_mode),       # fc1 bias
            spec((TH, Out_p), lambda i, h: (h, 0), w_mode),   # fc2 weights
            spec((1, Out_p), lambda i, h: (0, 0), resident),  # fc2 bias
        ],
        out_specs=spec((TB, Out_p), lambda i, h: (i, 0)),
        scratch_shapes=[pltpu.VMEM((TB, Out_p), jnp.float32)],
        compiler_params=pltpu.CompilerParams(
            dimension_semantics=("parallel", "arbitrary"),
            vmem_limit_bytes=vmem_limit,
        ),
    )(x_p, w1t, b1_p, w2t, b2_p)

    y = out_p[:B, :Out]       # padded batch rows / output lanes discarded here
    return y.reshape(*lead_shape, Out)


def two_layer_mlp(x, w1, b1, w2, b2, compute_dtype=jnp.bfloat16):
    """One-shot convenience wrapper.  For repeated calls with static weights,
    call prepare_mlp_params() once and reuse the result."""
    return two_layer_mlp_forward(
        x, prepare_mlp_params(w1, b1, w2, b2, compute_dtype=compute_dtype))


def init_params(seed, input_size, hidden_size, output_size=1):
    """Kaiming-normal-style init (std = sqrt(2 / fan_in)), zero biases."""
    key = jax.random.PRNGKey(seed)
    k1, k2 = jax.random.split(key)
    w1 = jax.random.normal(k1, (hidden_size, input_size), jnp.float32) * jnp.sqrt(
        2.0 / input_size)
    b1 = jnp.zeros((hidden_size,), jnp.float32)
    w2 = jax.random.normal(k2, (output_size, hidden_size), jnp.float32) * jnp.sqrt(
        2.0 / hidden_size)
    b2 = jnp.zeros((output_size,), jnp.float32)
    return w1, b1, w2, b2


if __name__ == "__main__":
    seed = 0

    # ---- Test 1: structural exactness on the f32 compute path, tiny shape.
    batch, input_size, hidden_size, output_size = 8, 16, 32, 1
    x = jax.random.normal(jax.random.PRNGKey(0), (batch, input_size), jnp.float32)
    w1, b1, w2, b2 = init_params(seed, input_size, hidden_size, output_size)

    params_f32 = prepare_mlp_params(w1, b1, w2, b2, compute_dtype=jnp.float32)
    y = jax.block_until_ready(two_layer_mlp_forward(x, params_f32))
    y_ref = jnp.maximum(x @ w1.T + b1, 0.0) @ w2.T + b2
    assert y.shape == (batch, output_size)
    assert jnp.allclose(y, y_ref, atol=1e-5, rtol=1e-5), float(
        jnp.max(jnp.abs(y - y_ref)))

    # ---- Test 2: bf16 fast path + multi-tile grid (2 batch tiles, 3 H tiles
    #      forced via a tiny vmem_budget) on a still-small shape.
    batch2, in2, hid2, out2 = 100, 160, 640, 1
    x2 = jax.random.normal(jax.random.PRNGKey(0), (batch2, in2), jnp.float32)
    w1b, b1b, w2b, b2b = init_params(seed + 1, in2, hid2, out2)
    params_bf16 = prepare_mlp_params(w1b, b1b, w2b, b2b)     # prepared once
    y2 = jax.block_until_ready(
        two_layer_mlp_forward(x2, params_bf16, vmem_budget=300_000))
    y2_ref = jnp.maximum(x2 @ w1b.T + b1b, 0.0) @ w2b.T + b2b
    assert y2.shape == (batch2, out2)
    # bf16 inputs/weights: tolerance loosened vs the f32 path.
    assert jnp.allclose(y2, y2_ref, atol=5e-2, rtol=5e-2), float(
        jnp.max(jnp.abs(y2 - y2_ref)))

    print("KERNEL_OK")
</pallas_src>

<mosaic_0001>
module attributes {stable_mosaic.version = 11 : i64} {
  func.func @_mlp_kernel(%arg0: i32, %arg1: i32, %arg2: memref<16x256xf32, #tpu.memory_space<vmem>>, %arg3: memref<256x256xf32, #tpu.memory_space<vmem>>, %arg4: memref<1x256xf32, #tpu.memory_space<vmem>>, %arg5: memref<256x128xf32, #tpu.memory_space<vmem>>, %arg6: memref<1x128xf32, #tpu.memory_space<vmem>>, %arg7: memref<16x128xf32, #tpu.memory_space<vmem>>, %arg8: memref<16x128xf32, #tpu.memory_space<vmem>>) attributes {dimension_semantics = [#tpu.dimension_semantics<parallel>, #tpu.dimension_semantics<arbitrary>], iteration_bounds = array<i64: 1, 1>, scalar_prefetch = 0 : i64, scratch_operands = 1 : i64, tpu.core_type = #tpu.core_type<tc>, window_params = [{transform_indices = @transform_0, window_bounds = array<i64: 16, 256>}, {pipeline_mode = #tpu.pipeline_mode<synchronous>, transform_indices = @transform_1, window_bounds = array<i64: 256, 256>}, {pipeline_mode = #tpu.pipeline_mode<synchronous>, transform_indices = @transform_2, window_bounds = array<i64: 1, 256>}, {pipeline_mode = #tpu.pipeline_mode<synchronous>, transform_indices = @transform_3, window_bounds = array<i64: 256, 128>}, {pipeline_mode = #tpu.pipeline_mode<synchronous>, transform_indices = @transform_4, window_bounds = array<i64: 1, 128>}, {transform_indices = @transform_5, window_bounds = array<i64: 16, 128>}]} {
    %c0_i32 = arith.constant 0 : i32
    %0 = arith.cmpi eq, %arg1, %c0_i32 : i32
    %1 = arith.extui %0 : i1 to i32
    %c0_i32_0 = arith.constant 0 : i32
    %2 = arith.cmpi ne, %1, %c0_i32_0 : i32
    scf.if %2 {
      %cst_16 = arith.constant 0.000000e+00 : f32
      %19 = vector.broadcast %cst_16 : f32 to vector<16x128xf32>
      %c0_17 = arith.constant 0 : index
      %c0_18 = arith.constant 0 : index
      %20 = vector.load %arg8[%c0_17, %c0_18] : memref<16x128xf32, #tpu.memory_space<vmem>>, vector<16x128xf32>
      tpu.vector_store %arg8[%c0_17, %c0_18], %19 {strides = array<i32>} : memref<16x128xf32, #tpu.memory_space<vmem>>, vector<16x128xf32>,
    } else {
    }
    %c0 = arith.constant 0 : index
    %c0_1 = arith.constant 0 : index
    %3 = vector.load %arg2[%c0, %c0_1] : memref<16x256xf32, #tpu.memory_space<vmem>>, vector<16x256xf32>
    %c0_2 = arith.constant 0 : index
    %c0_3 = arith.constant 0 : index
    %4 = vector.load %arg3[%c0_2, %c0_3] : memref<256x256xf32, #tpu.memory_space<vmem>>, vector<256x256xf32>
    %cst = arith.constant dense<0.000000e+00> : vector<16x256xf32>
    %5 = tpu.matmul %3, %4, %cst {dimension_numbers = #tpu.dot_dimension_numbers<[1], [0], [0], [1], [0, 0, 1, 1], [], []>} : vector<16x256xf32>, vector<256x256xf32>, vector<16x256xf32> -> vector<16x256xf32>
    %c0_4 = arith.constant 0 : index
    %c0_5 = arith.constant 0 : index
    %6 = vector.load %arg4[%c0_4, %c0_5] : memref<1x256xf32, #tpu.memory_space<vmem>>, vector<1x256xf32>
    %7 = vector.broadcast %6 : vector<1x256xf32> to vector<16x256xf32>
    %8 = arith.addf %5, %7 : vector<16x256xf32>
    %cst_6 = arith.constant 0.000000e+00 : f32
    %9 = vector.broadcast %cst_6 : f32 to vector<16x256xf32>
    %10 = arith.maximumf %8, %9 : vector<16x256xf32>
    %c0_7 = arith.constant 0 : index
    %c0_8 = arith.constant 0 : index
    %11 = vector.load %arg8[%c0_7, %c0_8] : memref<16x128xf32, #tpu.memory_space<vmem>>, vector<16x128xf32>
    %c0_9 = arith.constant 0 : index
    %c0_10 = arith.constant 0 : index
    %12 = vector.load %arg5[%c0_9, %c0_10] : memref<256x128xf32, #tpu.memory_space<vmem>>, vector<256x128xf32>
    %cst_11 = arith.constant dense<0.000000e+00> : vector<16x128xf32>
    %13 = tpu.matmul %10, %12, %cst_11 {dimension_numbers = #tpu.dot_dimension_numbers<[1], [0], [0], [1], [0, 0, 1, 1], [], []>} : vector<16x256xf32>, vector<256x128xf32>, vector<16x128xf32> -> vector<16x128xf32>
    %14 = arith.addf %11, %13 : vector<16x128xf32>
    %c0_12 = arith.constant 0 : index
    %c0_13 = arith.constant 0 : index
    %15 = vector.load %arg8[%c0_12, %c0_13] : memref<16x128xf32, #tpu.memory_space<vmem>>, vector<16x128xf32>
    tpu.vector_store %arg8[%c0_12, %c0_13], %14 {strides = array<i32>} : memref<16x128xf32, #tpu.memory_space<vmem>>, vector<16x128xf32>,
    %c0_i32_14 = arith.constant 0 : i32
    %16 = arith.cmpi eq, %arg1, %c0_i32_14 : i32
    %17 = arith.extui %16 : i1 to i32
    %c0_i32_15 = arith.constant 0 : i32
    %18 = arith.cmpi ne, %17, %c0_i32_15 : i32
    scf.if %18 {
      %c0_16 = arith.constant 0 : index
      %c0_17 = arith.constant 0 : index
      %19 = vector.load %arg8[%c0_16, %c0_17] : memref<16x128xf32, #tpu.memory_space<vmem>>, vector<16x128xf32>
      %c0_18 = arith.constant 0 : index
      %c0_19 = arith.constant 0 : index
      %20 = vector.load %arg6[%c0_18, %c0_19] : memref<1x128xf32, #tpu.memory_space<vmem>>, vector<1x128xf32>
      %21 = vector.broadcast %20 : vector<1x128xf32> to vector<16x128xf32>
      %22 = arith.addf %19, %21 : vector<16x128xf32>
      %c0_20 = arith.constant 0 : index
      %c0_21 = arith.constant 0 : index
      %23 = vector.load %arg7[%c0_20, %c0_21] : memref<16x128xf32, #tpu.memory_space<vmem>>, vector<16x128xf32>
      tpu.vector_store %arg7[%c0_20, %c0_21], %22 {strides = array<i32>} : memref<16x128xf32, #tpu.memory_space<vmem>>, vector<16x128xf32>,
    } else {
    }
    return
  }
  func.func @transform_0(%arg0: i32, %arg1: i32) -> (i32, i32) {
    %c0_i32 = arith.constant 0 : i32
    %c0_i32_0 = arith.constant 0 : i32
    return %arg0, %c0_i32 : i32, i32
  }
  func.func @transform_1(%arg0: i32, %arg1: i32) -> (i32, i32) {
    %c0_i32 = arith.constant 0 : i32
    %c0_i32_0 = arith.constant 0 : i32
    return %c0_i32, %arg1 : i32, i32
  }
  func.func @transform_2(%arg0: i32, %arg1: i32) -> (i32, i32) {
    %c0_i32 = arith.constant 0 : i32
    %c0_i32_0 = arith.constant 0 : i32
    return %c0_i32, %arg1 : i32, i32
  }
  func.func @transform_3(%arg0: i32, %arg1: i32) -> (i32, i32) {
    %c0_i32 = arith.constant 0 : i32
    %c0_i32_0 = arith.constant 0 : i32
    return %arg1, %c0_i32 : i32, i32
  }
  func.func @transform_4(%arg0: i32, %arg1: i32) -> (i32, i32) {
    %c0_i32 = arith.constant 0 : i32
    %c0_i32_0 = arith.constant 0 : i32
    %c0_i32_1 = arith.constant 0 : i32
    return %c0_i32, %c0_i32_0 : i32, i32
  }
  func.func @transform_5(%arg0: i32, %arg1: i32) -> (i32, i32) {
    %c0_i32 = arith.constant 0 : i32
    %c0_i32_0 = arith.constant 0 : i32
    return %arg0, %c0_i32 : i32, i32
  }
}

</mosaic_0001>

<bundles_post_ra>
// kernel: tpu_custom_call.1
= control target key start
LH: loop header
LB: loop body
LE: loop exit
PB: predicated region body
PF: predicated region fallthrough
CT: control target
= control target key end

     0   :  { %10 = vsyncpa [#allocation4], 0  ;;  %s718_s0 = inlined_call_operand.hbm [shape: f32[16,256], index: 0, kind: input, shape index: {}]   ;;  %s719_s1 = inlined_call_operand.hbm [shape: f32[256,256], index: 1, kind: input, shape index: {}]   ;;  %s720_s2 = inlined_call_operand.vmem [shape: f32[1,256], index: 2, kind: input, shape index: {}]   ;;  %s721_s3 = inlined_call_operand.hbm [shape: f32[256,128], index: 3, kind: input, shape index: {}]   ;;  %s722_s4 = inlined_call_operand.vmem [shape: f32[1,128], index: 4, kind: input, shape index: {}]   ;;  %s723_s5 = inlined_call_operand.hbm [shape: f32[16,128], index: 5, kind: output, shape index: {}]  }
   0x1   :  { %11 = vsyncpa [#allocation7], 0 }
   0x2   :  { %12 = vsyncpa [#allocation5], 0  ;;  %s613_s18 = smov [#allocation6]   ;;  %s614_s20 = smov [#allocation3]  }
   0x3   :  { %s30_s19 = sshll.u32 %s613_s18, 4  ;;  %s18_s21 = sshll.u32 %s614_s20, 4  ;;  %s31_s19 = int_to_ptr.vmem [resolvable:$true] %s30_s19  ;;  %s651_s21 = int_to_ptr.vmem [resolvable:$true] %s18_s21 }
   0x4   :  { %s519_s24 = scalar_lea.hbm %s719_s1, 8192 }
   0x5   :  { %p520_p0 = scmp.ne.s32.totalorder %s719_s1, %s519_s24  ;;  %p523_p1 = scmp.lt.u32.totalorder %s519_s24, %s719_s1 }
   0x7   :  { %p525_p2 = pnand %p523_p1, %p520_p0 }
   0x9   :  { %528 = shalt.err (!%p525_p2)
}
   0xa   :  { %s529_s29 = scalar_lea.vmem %s31_s19, 8192  ;;  %p534_p4 = scmp.lt.s32.totalorder %s31_s19, %s31_s19 }
   0xb   :  { %p530_p3 = scmp.ne.s32.totalorder %s31_s19, %s529_s29  ;;  %p535_p5 = scmp.lt.s32.totalorder %s529_s29, %s529_s29 }
   0xd   :  { %p536_p6 = por %p535_p5, %p534_p4 }
   0xf   :  { %p537_p7 = pnand %p536_p6, %p530_p3 }
  0x11   :  { %540 = shalt.err (!%p537_p7)
}
  0x12   :  { %s615_s30 = smov 256   ;;  %s616_s6 = smov 16  }
  0x13   :  { %36 = dma.hbm_to_vmem [thread:$0]  %s719_s1, 8192, %s31_s19, [#allocation7], %s615_s30, %s615_s30, %s616_s6  }
  0x14   :  { %s541_s11 = scalar_lea.hbm %s718_s0, 512 }
  0x15   :  { %p542_p8 = scmp.ne.s32.totalorder %s718_s0, %s541_s11  ;;  %p545_p9 = scmp.lt.u32.totalorder %s541_s11, %s718_s0 }
  0x17   :  { %p547_p10 = pnand %p545_p9, %p542_p8 }
  0x19   :  { %550 = shalt.err (!%p547_p10)
}
  0x1a   :  { %s551_s16 = scalar_lea.vmem %s651_s21, 512  ;;  %p556_p12 = scmp.lt.s32.totalorder %s651_s21, %s651_s21 }
  0x1b   :  { %p552_p11 = scmp.ne.s32.totalorder %s651_s21, %s551_s16  ;;  %p557_p13 = scmp.lt.s32.totalorder %s551_s16, %s551_s16 }
  0x1d   :  { %p558_p0 = por %p557_p13, %p556_p12 }
  0x1f   :  { %p559_p1 = pnand %p558_p0, %p552_p11 }
  0x21   :  { %562 = shalt.err (!%p559_p1)
}
  0x22   :  { %24 = dma.hbm_to_vmem [thread:$0]  %s718_s0, 512, %s651_s21, [#allocation4], %s615_s30, %s615_s30, %s616_s6  }
  0x23   :  { %s617_s18 = smov [#allocation8]   ;;  %s563_s23 = scalar_lea.hbm %s721_s3, 4096 }
  0x24   :  { %s44_s19 = sshll.u32 %s617_s18, 4  ;;  %p564_p2 = scmp.ne.s32.totalorder %s721_s3, %s563_s23  ;;  %s45_s19 = int_to_ptr.vmem [resolvable:$true] %s44_s19 }
  0x25   :  { %p567_p3 = scmp.lt.u32.totalorder %s563_s23, %s721_s3 }
  0x27   :  { %p569_p4 = pnand %p567_p3, %p564_p2 }
  0x29   :  { %572 = shalt.err (!%p569_p4)
}
  0x2a   :  { %s573_s28 = scalar_lea.vmem %s45_s19, 4096  ;;  %p578_p6 = scmp.lt.s32.totalorder %s45_s19, %s45_s19 }
  0x2b   :  { %p574_p5 = scmp.ne.s32.totalorder %s45_s19, %s573_s28  ;;  %p579_p7 = scmp.lt.s32.totalorder %s573_s28, %s573_s28 }
  0x2d   :  { %p580_p8 = por %p579_p7, %p578_p6 }
  0x2f   :  { %p581_p9 = pnand %p580_p8, %p574_p5 }
  0x31   :  { %584 = shalt.err (!%p581_p9)
}
  0x32   :  { %s618_s0 = smov 128   ;;  %s619_s21 = smov 8  }
  0x33   :  { %50 = dma.hbm_to_vmem [thread:$0]  %s721_s3, 4096, %s45_s19, [#allocation7], %s618_s0, %s618_s0, %s619_s21  }
  0x34   :  { %607 = dma.done.wait [#allocation4], 512  }
  0x35   :  { %608 = vsyncadd [#allocation4], 4294966784 }
  0x36   :  { %609 = dma.done.wait [#allocation7], 12288  }
  0x37   :  { %610 = vsyncadd [#allocation7], 4294955008  ;;  %v73_v0 = vld [vmem:[#allocation6 + $0x8] sm:$0xff]  ;;  %v75_v1 = vld [vmem:[#allocation6 + $0x18] sm:$0xff]  ;;  %s620_s8 = smov [#allocation9]  }
  0x38   :  { %v72_v2 = vld [vmem:[#allocation6] sm:$0xff]  ;;  %v415_v3 = vpack.c.bf16 %v75_v1, %v73_v0  ;;  %v74_v4 = vld [vmem:[#allocation6 + $0x10] sm:$0xff]  ;;  %v77_v5 = vld [vmem:[#allocation6 + $0x28] sm:$0xff]  ;;  %s363_s9 = sshll.u32 %s620_s8, 4  ;;  %s364_s9 = int_to_ptr.vmem [resolvable:$true] %s363_s9 }
  0x39   :  { %v79_v6 = vld [vmem:[#allocation6 + $0x38] sm:$0xff]  ;;  %v417_v7 = vpack.c.bf16 %v74_v4, %v72_v2  ;;  %v76_v9 = vld [vmem:[#allocation6 + $0x20] sm:$0xff]  ;;  %v78_v10 = vld [vmem:[#allocation6 + $0x30] sm:$0xff]  ;;  %s585_s10 = scalar_lea.vmem %s364_s9, 256  ;;  %p590_p11 = scmp.lt.s32.totalorder %s364_s9, %s364_s9 }
  0x3a   :  { %v419_v8 = vpack.c.bf16 %v79_v6, %v77_v5  ;;  %v81_v11 = vld [vmem:[#allocation6 + $0x48] sm:$0xff]  ;;  %416 = vmatprep.subr.bf16.mxu0 %v415_v3  ;;  %v83_v12 = vld [vmem:[#allocation6 + $0x58] sm:$0xff]  ;;  %v421_v13 = vpack.c.bf16 %v78_v10, %v76_v9  ;;  %v80_v15 = vld [vmem:[#allocation6 + $0x40] sm:$0xff]  ;;  %p586_p10 = scmp.ne.s32.totalorder %s364_s9, %s585_s10  ;;  %p591_p12 = scmp.lt.s32.totalorder %s585_s10, %s585_s10 }
  0x3b   :  { %418 = vmatpush1.bf16.msra.mxu0 %v417_v7  ;;  %v423_v14 = vpack.c.bf16 %v83_v12, %v81_v11  ;;  %v82_v16 = vld [vmem:[#allocation6 + $0x50] sm:$0xff]  ;;  %v85_v17 = vld [vmem:[#allocation6 + $0x68] sm:$0xff]  ;;  %v87_v18 = vld [vmem:[#allocation6 + $0x78] sm:$0xff] }
  0x3c   :  { %420 = vmatprep.subr.bf16.mxu0 %v419_v8  ;;  %v425_v19 = vpack.c.bf16 %v82_v16, %v80_v15  ;;  %v427_v20 = vpack.c.bf16 %v87_v18, %v85_v17  ;;  %v84_v21 = vld [vmem:[#allocation6 + $0x60] sm:$0xff]  ;;  %v86_v22 = vld [vmem:[#allocation6 + $0x70] sm:$0xff]  ;;  %v89_v23 = vld [vmem:[#allocation6 + $0x88] sm:$0xff]  ;;  %p592_p13 = por %p591_p12, %p590_p11 }
  0x3d   :  { %v91_v24 = vld [vmem:[#allocation6 + $0x98] sm:$0xff]  ;;  %v429_v25 = vpack.c.bf16 %v86_v22, %v84_v21  ;;  %v88_v27 = vld [vmem:[#allocation6 + $0x80] sm:$0xff]  ;;  %v90_v28 = vld [vmem:[#allocation6 + $0x90] sm:$0xff] }
  0x3e   :  { %v431_v26 = vpack.c.bf16 %v91_v24, %v89_v23  ;;  %v93_v29 = vld [vmem:[#allocation6 + $0xa8] sm:$0xff]  ;;  %v95_v30 = vld [vmem:[#allocation6 + $0xb8] sm:$0xff]  ;;  %v433_v31 = vpack.c.bf16 %v90_v28, %v88_v27  ;;  %v92_v33 = vld [vmem:[#allocation6 + $0xa0] sm:$0xff]  ;;  %p593_p0 = pnand %p592_p13, %p586_p10 }
  0x3f   :  { %422 = vmatpush1.bf16.msra.mxu0 %v421_v13  ;;  %v435_v32 = vpack.c.bf16 %v95_v30, %v93_v29  ;;  %v94_v34 = vld [vmem:[#allocation6 + $0xb0] sm:$0xff]  ;;  %v97_v35 = vld [vmem:[#allocation6 + $0xc8] sm:$0xff]  ;;  %v99_v36 = vld [vmem:[#allocation6 + $0xd8] sm:$0xff] }
  0x40   :  { %424 = vmatprep.subr.bf16.mxu0 %v423_v14  ;;  %v437_v37 = vpack.c.bf16 %v94_v34, %v92_v33  ;;  %v439_v38 = vpack.c.bf16 %v99_v36, %v97_v35  ;;  %v96_v39 = vld [vmem:[#allocation6 + $0xc0] sm:$0xff]  ;;  %v98_v40 = vld [vmem:[#allocation6 + $0xd0] sm:$0xff]  ;;  %v69_v41 = vld [vmem:[#allocation3 + $0x8] sm:$0xff] }
  0x41   :  { %v101_v42 = vld [vmem:[#allocation6 + $0xe8] sm:$0xff]  ;;  %v103_v43 = vld [vmem:[#allocation6 + $0xf8] sm:$0xff]  ;;  %212 = vmatprep.mubr.f32.mxu0 %v69_v41  ;;  %v247_v44 = vld [vmem:[#allocation8 + $0x80] sm:$0xff]  ;;  %v441_v50 = vpack.c.bf16 %v98_v40, %v96_v39 }
  0x42   :  { %v100_v45 = vld [vmem:[#allocation6 + $0xe0] sm:$0xff]  ;;  %v102_v46 = vld [vmem:[#allocation6 + $0xf0] sm:$0xff]  ;;  %v248_v47 = vld [vmem:[#allocation8 + $0x88] sm:$0xff]  ;;  %v443_v56 = vpack.c.bf16 %v103_v43, %v101_v42 }
  0x43   :  { %426 = vmatpush1.bf16.msra.mxu0 %v425_v19  ;;  %v231_v48 = vld [vmem:[#allocation8] sm:$0xff]  ;;  %v232_v49 = vld [vmem:[#allocation8 + $0x8] sm:$0xff]  ;;  %v479_v51 = vpack.c.bf16 %v248_v47, %v247_v44  ;;  %v249_v53 = vld [vmem:[#allocation8 + $0x90] sm:$0xff]  ;;  %v445_v0 = vpack.c.bf16 %v102_v46, %v100_v45 }
  0x44   :  { %428 = vmatprep.subr.bf16.mxu0 %v427_v20  ;;  %v481_v52 = vpack.c.bf16 %v232_v49, %v231_v48  ;;  %v250_v54 = vld [vmem:[#allocation8 + $0x98] sm:$0xff]  ;;  %v233_v55 = vld [vmem:[#allocation8 + $0x10] sm:$0xff]  ;;  %v251_v59 = vld [vmem:[#allocation8 + $0xa0] sm:$0xff] }
  0x45   :  { %v483_v57 = vpack.c.bf16 %v250_v54, %v249_v53  ;;  %v234_v58 = vld [vmem:[#allocation8 + $0x18] sm:$0xff]  ;;  %v252_v60 = vld [vmem:[#allocation8 + $0xa8] sm:$0xff]  ;;  %480 = vmatprep.subr.bf16.mxu1 %v479_v51  ;;  %v104_v1 = vld [vmem:[#allocation6 + $0x100] sm:$0xff] }
  0x46   :  { %v105_v61 = vld [vmem:[#allocation6 + $0x108] sm:$0xff]  ;;  %v107_v62 = vld [vmem:[#allocation6 + $0x118] sm:$0xff]  ;;  %482 = vmatpush3.bf16.msra.mxu1 %v481_v52  ;;  %v485_v63 = vpack.c.bf16 %v234_v58, %v233_v55  ;;  %v487_v2 = vpack.c.bf16 %v252_v60, %v251_v59  ;;  %v235_v3 = vld [vmem:[#allocation8 + $0x20] sm:$0xff] }
  0x47   :  { %430 = vmatpush1.bf16.msra.mxu0 %v429_v25  ;;  %484 = vmatprep.subr.bf16.mxu1 %v483_v57  ;;  %v236_v4 = vld [vmem:[#allocation8 + $0x28] sm:$0xff]  ;;  %v447_v5 = vpack.c.bf16 %v107_v62, %v105_v61  ;;  %v106_v6 = vld [vmem:[#allocation6 + $0x110] sm:$0xff]  ;;  %v254_v8 = vld [vmem:[#allocation8 + $0xb8] sm:$0xff] }
  0x48   :  { %432 = vmatprep.subr.bf16.mxu0 %v431_v26  ;;  %v253_v7 = vld [vmem:[#allocation8 + $0xb0] sm:$0xff]  ;;  %v109_v9 = vld [vmem:[#allocation6 + $0x128] sm:$0xff]  ;;  %v111_v10 = vld [vmem:[#allocation6 + $0x138] sm:$0xff]  ;;  %v489_v11 = vpack.c.bf16 %v236_v4, %v235_v3  ;;  %v449_v12 = vpack.c.bf16 %v106_v6, %v104_v1 }
  0x49   :  { %v108_v13 = vld [vmem:[#allocation6 + $0x120] sm:$0xff]  ;;  %v491_v14 = vpack.c.bf16 %v254_v8, %v253_v7  ;;  %v237_v15 = vld [vmem:[#allocation8 + $0x30] sm:$0xff]  ;;  %v238_v16 = vld [vmem:[#allocation8 + $0x38] sm:$0xff]  ;;  %v451_v17 = vpack.c.bf16 %v111_v10, %v109_v9 }
  0x4a   :  { %486 = vmatpush3.bf16.msra.mxu1 %v485_v63  ;;  %v110_v18 = vld [vmem:[#allocation6 + $0x130] sm:$0xff]  ;;  %v255_v19 = vld [vmem:[#allocation8 + $0xc0] sm:$0xff]  ;;  %v256_v20 = vld [vmem:[#allocation8 + $0xc8] sm:$0xff]  ;;  %v493_v23 = vpack.c.bf16 %v238_v16, %v237_v15 }
  0x4b   :  { %434 = vmatpush1.bf16.msra.mxu0 %v433_v31  ;;  %488 = vmatprep.subr.bf16.mxu1 %v487_v2  ;;  %v113_v21 = vld [vmem:[#allocation6 + $0x148] sm:$0xff]  ;;  %v115_v22 = vld [vmem:[#allocation6 + $0x158] sm:$0xff]  ;;  %v453_v24 = vpack.c.bf16 %v110_v18, %v108_v13  ;;  %v112_v25 = vld [vmem:[#allocation6 + $0x140] sm:$0xff]  ;;  %v495_v26 = vpack.c.bf16 %v256_v20, %v255_v19  ;;  %v138_v20 = vlaneseq }
  0x4c   :  { %436 = vmatprep.subr.bf16.mxu0 %v435_v32  ;;  %v239_v27 = vld [vmem:[#allocation8 + $0x40] sm:$0xff]  ;;  %v240_v28 = vld [vmem:[#allocation8 + $0x48] sm:$0xff]  ;;  %v455_v29 = vpack.c.bf16 %v115_v22, %v113_v21  ;;  %v114_v30 = vld [vmem:[#allocation6 + $0x150] sm:$0xff] }
  0x4d   :  { %v257_v31 = vld [vmem:[#allocation8 + $0xd0] sm:$0xff]  ;;  %v258_v32 = vld [vmem:[#allocation8 + $0xd8] sm:$0xff]  ;;  %v117_v33 = vld [vmem:[#allocation6 + $0x168] sm:$0xff]  ;;  %v497_v35 = vpack.c.bf16 %v240_v28, %v239_v27  ;;  %v457_v36 = vpack.c.bf16 %v114_v30, %v112_v25  ;;  %v139_v21 = vshrl.u32 %v138_v20, 7 }
  0x4e   :  { %490 = vmatpush3.bf16.msra.mxu1 %v489_v11  ;;  %v119_v34 = vld [vmem:[#allocation6 + $0x178] sm:$0xff]  ;;  %v241_v39 = vld [vmem:[#allocation8 + $0x50] sm:$0xff]  ;;  %v259_v43 = vld [vmem:[#allocation8 + $0xe0] sm:$0xff] }
  0x4f   :  { %438 = vmatpush1.bf16.msra.mxu0 %v437_v37  ;;  %492 = vmatprep.subr.bf16.mxu1 %v491_v14  ;;  %v116_v37 = vld [vmem:[#allocation6 + $0x160] sm:$0xff]  ;;  %v242_v40 = vld [vmem:[#allocation8 + $0x58] sm:$0xff]  ;;  %v459_v41 = vpack.c.bf16 %v119_v34, %v117_v33  ;;  %v118_v42 = vld [vmem:[#allocation6 + $0x170] sm:$0xff]  ;;  %v140_v22 = vsub.s32 0, %v139_v21 }
  0x50   :  { %440 = vmatprep.subr.bf16.mxu0 %v439_v38  ;;  %v499_v38 = vpack.c.bf16 %v258_v32, %v257_v31  ;;  %v260_v44 = vld [vmem:[#allocation8 + $0xe8] sm:$0xff]  ;;  %v123_v46 = vld [vmem:[#allocation6 + $0x198] sm:$0xff]  ;;  %v501_v47 = vpack.c.bf16 %v242_v40, %v241_v39  ;;  %v461_v48 = vpack.c.bf16 %v118_v42, %v116_v37  ;;  %v120_v51 = vld [vmem:[#allocation6 + $0x180] sm:$0xff] }
  0x51   :  { %v121_v45 = vld [vmem:[#allocation6 + $0x188] sm:$0xff]  ;;  %v503_v49 = vpack.c.bf16 %v260_v44, %v259_v43  ;;  %v122_v52 = vld [vmem:[#allocation6 + $0x190] sm:$0xff]  ;;  %v127_v54 = vld [vmem:[#allocation6 + $0x1b8] sm:$0xff] }
  0x52   :  { %494 = vmatpush3.bf16.msra.mxu1 %v493_v23  ;;  %v125_v53 = vld [vmem:[#allocation6 + $0x1a8] sm:$0xff]  ;;  %v465_v55 = vpack.c.bf16 %v122_v52, %v120_v51  ;;  %v124_v57 = vld [vmem:[#allocation6 + $0x1a0] sm:$0xff]  ;;  %v126_v58 = vld [vmem:[#allocation6 + $0x1b0] sm:$0xff] }
  0x53   :  { %442 = vmatpush1.bf16.msra.mxu0 %v441_v50  ;;  %496 = vmatprep.subr.bf16.mxu1 %v495_v26  ;;  %v463_v50 = vpack.c.bf16 %v123_v46, %v121_v45  ;;  %v129_v59 = vld [vmem:[#allocation6 + $0x1c8] sm:$0xff]  ;;  %v131_v60 = vld [vmem:[#allocation6 + $0x1d8] sm:$0xff]  ;;  %v469_v61 = vpack.c.bf16 %v126_v58, %v124_v57  ;;  %v128_v63 = vld [vmem:[#allocation6 + $0x1c0] sm:$0xff] }
  0x54   :  { %444 = vmatprep.subr.bf16.mxu0 %v443_v56  ;;  %v467_v56 = vpack.c.bf16 %v127_v54, %v125_v53  ;;  %v471_v62 = vpack.c.bf16 %v131_v60, %v129_v59  ;;  %v133_v1 = vld [vmem:[#allocation6 + $0x1e8] sm:$0xff]  ;;  %v135_v2 = vld [vmem:[#allocation6 + $0x1f8] sm:$0xff]  ;;  %v134_v6 = vld [vmem:[#allocation6 + $0x1f0] sm:$0xff] }
  0x55   :  { %v475_v4 = vpack.c.bf16 %v135_v2, %v133_v1  ;;  %v68_v8 = vld [vmem:[#allocation3] sm:$0xff]  ;;  %v71_v9 = vld [vmem:[#allocation3 + $0x18] sm:$0xff]  ;;  %v70_v10 = vld [vmem:[#allocation3 + $0x10] sm:$0xff] }
  0x56   :  { %498 = vmatpush3.bf16.msra.mxu1 %v497_v35  ;;  %v243_v11 = vld [vmem:[#allocation8 + $0x60] sm:$0xff]  ;;  %v261_v14 = vld [vmem:[#allocation8 + $0xf0] sm:$0xff]  ;;  %v262_v15 = vld [vmem:[#allocation8 + $0xf8] sm:$0xff] }
  0x57   :  { %446 = vmatpush1.bf16.msra.mxu0 %v445_v0  ;;  %500 = vmatprep.subr.bf16.mxu1 %v499_v38  ;;  %v130_v0 = vld [vmem:[#allocation6 + $0x1d0] sm:$0xff]  ;;  %v507_v16 = vpack.c.bf16 %v262_v15, %v261_v14  ;;  %v246_v18 = vld [vmem:[#allocation8 + $0x78] sm:$0xff]  ;;  %v136_v23 = vld [vmem:[%s720_s2] sm:$0x3] }
  0x58   :  { %448 = vmatprep.subr.bf16.mxu0 %v447_v5  ;;  %v473_v3 = vpack.c.bf16 %v130_v0, %v128_v63  ;;  %v132_v5 = vld [vmem:[#allocation6 + $0x1e0] sm:$0xff]  ;;  %v141_v25 = vrot.slane %v136_v23, %v140_v22 }
  0x59   :  { %v477_v7 = vpack.c.bf16 %v134_v6, %v132_v5 }
  0x5a   :  { %502 = vmatpush3.bf16.msra.mxu1 %v501_v47 }
  0x5b   :  { %450 = vmatpush1.bf16.msra.mxu0 %v449_v12  ;;  %504 = vmatprep.subr.bf16.mxu1 %v503_v49  ;;  %v244_v12 = vld [vmem:[#allocation8 + $0x68] sm:$0xff] }
  0x5c   :  { %452 = vmatprep.subr.bf16.mxu0 %v451_v17  ;;  %v505_v13 = vpack.c.bf16 %v244_v12, %v243_v11  ;;  %v245_v17 = vld [vmem:[#allocation8 + $0x70] sm:$0xff] }
  0x5d   :  { %v509_v19 = vpack.c.bf16 %v246_v18, %v245_v17 }
  0x5e   :  { %506 = vmatpush3.bf16.msra.mxu1 %v505_v13 }
  0x5f   :  { %454 = vmatpush1.bf16.msra.mxu0 %v453_v24  ;;  %508 = vmatprep.subr.bf16.mxu1 %v507_v16  ;;  %v144_v24 = vsub.s32 1, %v139_v21 }
  0x60   :  { %456 = vmatprep.subr.bf16.mxu0 %v455_v29 }
  0x61   :  { %v145_v26 = vrot.slane %v136_v23, %v144_v24 }
  0x62   :  { %510 = vmatpush3.bf16.msra.mxu1 %v509_v19 }
  0x63   :  { %458 = vmatpush1.bf16.msra.mxu0 %v457_v36 }
  0x64   :  { %460 = vmatprep.subr.bf16.mxu0 %v459_v41  ;;  %v376_v41 = vld [vmem:[%s722_s4] ss:$0 sm:$0xff] }
  0x67   :  { %462 = vmatpush1.bf16.msra.mxu0 %v461_v48 }
  0x68   :  { %464 = vmatprep.subr.bf16.mxu0 %v463_v50 }
  0x6b   :  { %466 = vmatpush1.bf16.msra.mxu0 %v465_v55 }
  0x6c   :  { %468 = vmatprep.subr.bf16.mxu0 %v467_v56 }
  0x6f   :  { %470 = vmatpush1.bf16.msra.mxu0 %v469_v61 }
  0x70   :  { %472 = vmatprep.subr.bf16.mxu0 %v471_v62 }
  0x73   :  { %474 = vmatpush1.bf16.msra.mxu0 %v473_v3 }
  0x74   :  { %476 = vmatprep.subr.bf16.mxu0 %v475_v4 }
  0x77   :  { %478 = vmatpush1.bf16.msra.mxu0 %v477_v7 }
  0x7a   :  { %213 = vmatmul.mubr.f32.vlgmr.msra.gmra.mrb[0].mxu0 %v68_v8 }
  0x7b   :  { %218 = vmatprep.mubr.f32.mxu0 %v71_v9 }
  0x7e   :  { %219 = vmatmul.mubr.f32.gmra.mrb[2].mxu0 %v70_v10 }
 0x14d   :  { %v214_v27 = vpop.f32.mrb[0].mxu0 }
 0x14e   :  { %v215_v28 = vadd.f32 %v214_v27, %v141_v25  ;;  %v216_v29 = vpop.f32.mrb[1].mxu0 }
 0x14f   :  { %v217_v30 = vadd.f32 %v216_v29, %v145_v26 }
 0x150   :  { %v225_v33 = vmax.f32 %v215_v28, 0.0 }
 0x151   :  { %v220_v31 = vpop.f32.mrb[2].mxu0  ;;  %v226_v32 = vmax.f32 %v217_v30, 0.0 }
 0x152   :  { %v221_v34 = vadd.f32 %v220_v31, %v141_v25  ;;  %v222_v35 = vpop.f32.mrb[3].mxu0 }
 0x153   :  { %v223_v36 = vadd.f32 %v222_v35, %v145_v26  ;;  %327 = vmatprep.mubr.f32.mxu1 %v226_v32 }
 0x154   :  { %328 = vmatmul.mubr.f32.vlgmr.msra.gmra.mrb[0].mxu1 %v225_v33  ;;  %v227_v38 = vmax.f32 %v221_v34, 0.0 }
 0x155   :  { %v228_v37 = vmax.f32 %v223_v36, 0.0 }
 0x157   :  { %332 = vmatprep.mubr.f32.mxu1 %v228_v37 }
 0x158   :  { %333 = vmatmul.mubr.f32.gmra.mrb[2].mxu1 %v227_v38 }
 0x227   :  { %v409_v39 = vpop.f32.mrb[0].mxu1 }
 0x228   :  { %v410_v40 = vpop.f32.mrb[1].mxu1 }
 0x229   :  { %v411_v42 = vadd.f32 %v410_v40, %v409_v39 }
 0x22b   :  { %v354_v43 = vadd.f32 %v411_v42, %v376_v41  ;;  %v412_v44 = vpop.f32.mrb[2].mxu1 }
 0x22c   :  { %v413_v45 = vpop.f32.mrb[3].mxu1 }
 0x22d   :  { %356 = vst [vmem:[#allocation9] sm:$0xff] %v354_v43  ;;  %v414_v46 = vadd.f32 %v413_v45, %v412_v44 }
 0x22f   :  { %v355_v47 = vadd.f32 %v414_v46, %v376_v41 }
 0x231   :  { %357 = vst [vmem:[#allocation9 + $0x8] sm:$0xff] %v355_v47 }
 0x232   :  { %596 = shalt.err (!%p593_p0)
}
 0x233   :  { %s597_s12 = scalar_lea.hbm %s723_s5, 256 }
 0x234   :  { %p598_p1 = scmp.ne.s32.totalorder %s723_s5, %s597_s12  ;;  %p601_p2 = scmp.lt.u32.totalorder %s597_s12, %s723_s5 }
 0x236   :  { %p603_p3 = pnand %p601_p2, %p598_p1 }
 0x238   :  { %606 = shalt.err (!%p603_p3)
}
 0x239   :  { %369 = dma.vmem_to_hbm [thread:$0]  %s364_s9, 256, %s723_s5, [#allocation5], %s618_s0, %s618_s0, %s619_s21  }
 0x23a   :  { %611 = dma.done.wait [#allocation5], 256  }
 0x23b   :  { %612 = vsyncadd [#allocation5], 4294967040 }
 0x23c   :  { %373 = vsyncpa [#allocation4], 1 }
 0x23d   :  { %374 = vsyncpa [#allocation7], 1 }
 0x23e   :  { %375 = vsyncpa [#allocation5], 1 }

</bundles_post_ra>
